<compile_context>
chip_gen: v5e
topology: v5e:2x2
jax: 0.10.0
libtpu: 0.0.40
codegen_flags: <defaults>
</compile_context>

<pallas_src>
import functools
import math

import jax
import jax.numpy as jnp
from jax.experimental import pallas as pl
from jax.experimental.pallas import tpu as pltpu


# ---------------------------------------------------------------------------
# Small synthetic config (same structure as T5Config, scaled down)
# ---------------------------------------------------------------------------
class SmallT5Config:
    d_model = 32
    num_heads = 4
    relative_attention_num_buckets = 8
    relative_attention_max_distance = 16
    dropout_rate = 0.1
    is_decoder = False


# ---------------------------------------------------------------------------
# Relative position bias (glue, plain JAX) — mirrors T5Attention.compute_bias
# ---------------------------------------------------------------------------
def relative_position_bucket(relative_position, bidirectional, num_buckets, max_distance):
    relative_buckets = jnp.zeros_like(relative_position)
    if bidirectional:
        num_buckets //= 2
        relative_buckets = relative_buckets + (relative_position > 0).astype(jnp.int32) * num_buckets
        relative_position = jnp.abs(relative_position)
    else:
        relative_position = -jnp.minimum(relative_position, jnp.zeros_like(relative_position))
    max_exact = num_buckets // 2
    is_small = relative_position < max_exact
    # Clamp to >=1 inside the log so relative_position==0 never hits log(0);
    # the jnp.where below selects the "small" branch there anyway (matches HF).
    rel_for_log = jnp.maximum(relative_position, 1).astype(jnp.float32)
    rel_pos_if_large = max_exact + (
        jnp.log(rel_for_log / max_exact)
        / math.log(max_distance / max_exact)
        * (num_buckets - max_exact)
    ).astype(jnp.int32)
    rel_pos_if_large = jnp.minimum(rel_pos_if_large, num_buckets - 1)
    relative_buckets = relative_buckets + jnp.where(is_small, relative_position, rel_pos_if_large)
    return relative_buckets


def compute_bias(rel_emb, query_length, key_length, is_decoder, num_buckets, max_distance):
    context_position = jnp.arange(query_length)[:, None]
    memory_position = jnp.arange(key_length)[None, :]
    relative_position = memory_position - context_position              # (S, S)
    buckets = relative_position_bucket(
        relative_position,
        bidirectional=not is_decoder,
        num_buckets=num_buckets,
        max_distance=max_distance,
    )
    values = rel_emb[buckets]                                           # (S, S, H)
    values = jnp.transpose(values, (2, 0, 1))[None, :, :, :]            # (1, H, S, S)
    return values


# ---------------------------------------------------------------------------
# Pallas kernel: one (batch item, query tile) per grid step.
# ---------------------------------------------------------------------------
def t5_attention_kernel(xq_ref, xkv_ref, mask_ref, wqkv_ref, wo_ref, bias_ref, o_ref,
                        *, num_heads, head_dim, d_model):
    H, dh, D = num_heads, head_dim, d_model

    x_q = xq_ref[0]                       # (tq, D) bf16 — query rows for this tile
    x_kv = xkv_ref[0]                     # (S,  D) bf16 — full key/value rows
    wqkv = wqkv_ref[...]                  # (D, 3D) bf16 — [Wq | Wk | Wv]
    wo = wo_ref[...]                      # (D, Dp) bf16
    mask = mask_ref[0].astype(jnp.float32)  # (1, S) additive mask (0 / -inf)

    # Full-width MXU projections (no per-head N=dh matmuls, no x broadcast).
    q = jnp.dot(x_q, wqkv[:, :D], preferred_element_type=jnp.float32)        # (tq, D)
    kv = jnp.dot(x_kv, wqkv[:, D:], preferred_element_type=jnp.float32)      # (S, 2D)

    q = q.astype(jnp.bfloat16)
    k = kv[:, :D].astype(jnp.bfloat16)
    v = kv[:, D:].astype(jnp.bfloat16)

    # Per-head attention; head slices are cheap static lane slices (dh=64 for
    # real T5). Only a (tq, S) f32 score block is live at a time.
    ctx_heads = []
    for h in range(H):
        sl = slice(h * dh, (h + 1) * dh)
        s = jnp.einsum("qd,kd->qk", q[:, sl], k[:, sl],
                       preferred_element_type=jnp.float32)                   # (tq, S)
        s = s + bias_ref[0, h].astype(jnp.float32) + mask
        # Softmax over keys (T5 has no 1/sqrt(d) scaling): f32 on VPU,
        # reciprocal on the otherwise-idle EUP.
        m = jnp.max(s, axis=-1, keepdims=True)
        p = jnp.exp(s - m)
        attn = p * pl.reciprocal(jnp.sum(p, axis=-1, keepdims=True), approx=True)
        # TODO(synk): attention-weight dropout skipped (eval-mode semantics).
        ctx_heads.append(jnp.dot(attn.astype(jnp.bfloat16), v[:, sl],
                                 preferred_element_type=jnp.float32))         # (tq, dh)

    # Fold the head reduction into the output projection: lane-concat the
    # per-head contexts into (tq, H*dh) and do a single (tq, D) x (D, Dp)
    # matmul — the MXU performs the head sum as part of the K=D contraction.
    ctx = jnp.concatenate(ctx_heads, axis=-1).astype(jnp.bfloat16)            # (tq, D)
    out = jnp.dot(ctx, wo, preferred_element_type=jnp.float32)                # (tq, Dp)
    o_ref[0] = out.astype(o_ref.dtype)


def _pick_query_tile(S):
    if S <= 256:
        return S
    for cand in (256, 128, 64, 32, 16, 8):
        if S % cand == 0:
            return cand
    return S


def t5_attention_forward(hidden_states, wq, wk, wv, wo, rel_emb, cfg, attention_mask=None):
    """Returns (attn_output, position_bias) like the PyTorch module.

    TODO(synk): cross-attention (key_value_states) and incremental-decoding
    paths are not implemented; self-attention only.
    """
    B, S, D = hidden_states.shape
    H = cfg.num_heads
    dh = D // H
    # Lane-dense output width; for production T5 (D multiple of 128) this is D.
    Dp = D if D % 128 == 0 else ((D + 127) // 128) * 128

    # position_bias glue (plain JAX): bucketing + embedding gather is cheap.
    position_bias = compute_bias(
        rel_emb, S, S, cfg.is_decoder,
        cfg.relative_attention_num_buckets, cfg.relative_attention_max_distance,
    ).astype(jnp.float32)                                          # (1, H, S, S)

    # Additive mask travels as a tiny (B, 1, S) block; the (1, H, S, S)
    # position bias is never broadcast to (B, H, S, S) in HBM.
    if attention_mask is not None:
        # NOTE: mask must already be additive (0 / -inf), like HF's extended mask.
        mask_add = attention_mask.reshape(B, -1)[:, -S:].astype(jnp.float32).reshape(B, 1, S)
        returned_bias = position_bias + mask_add[:, None, :, :]    # return-value only
    else:
        mask_add = jnp.zeros((B, 1, S), jnp.float32)
        returned_bias = position_bias

    # Packed projection weights: one (D, 3D) [Wq|Wk|Wv] block (the native
    # column layout already has heads major within D, so per-head slices in
    # the kernel line up with torch's view(B, S, H, dh)).
    wqkv = jnp.concatenate([wq, wk, wv], axis=1).astype(jnp.bfloat16)         # (D, 3D)
    wo_p = wo if Dp == D else jnp.pad(wo, ((0, 0), (0, Dp - D)))
    wo_p = wo_p.astype(jnp.bfloat16)                                          # (D, Dp)
    bias_in = position_bias.astype(jnp.bfloat16)     # halve bias DMA; upcast in-kernel
    x_in = hidden_states.astype(jnp.bfloat16)

    tq = _pick_query_tile(S)
    nq = S // tq
    grid = (B, nq)
    # TODO(synk): for very long S, add key-tile iteration with online softmax
    # (flash pattern) so the (tq, S) score/bias blocks also stay bounded.

    # Per-step VMEM footprint (bytes) -> explicit vmem_limit_bytes so the same
    # code stays under v5e/v6e default scoped limits and v7x's 64 MiB physical.
    block_bytes = (
        tq * D * 2 + S * D * 2            # x query tile + x key/value rows (bf16)
        + S * 4                           # additive mask (f32)
        + D * 3 * D * 2 + D * Dp * 2      # fused Wqkv + Wo (bf16)
        + H * tq * S * 2                  # position-bias block (bf16)
        + tq * Dp * 4                     # output tile (f32)
        + tq * S * 4 * 2                  # live f32 score block (+ headroom)
    )
    vmem_limit = int(min(96 * 2**20, max(32 * 2**20, 6 * block_bytes)))

    kernel = functools.partial(t5_attention_kernel, num_heads=H, head_dim=dh, d_model=D)

    out_padded = pl.pallas_call(
        kernel,
        out_shape=jax.ShapeDtypeStruct((B, S, Dp), hidden_states.dtype),
        grid_spec=pltpu.PrefetchScalarGridSpec(
            num_scalar_prefetch=0,
            grid=grid,
            in_specs=[
                pl.BlockSpec((1, tq, D), lambda b, qi: (b, qi, 0)),        # query rows
                pl.BlockSpec((1, S, D), lambda b, qi: (b, 0, 0)),          # key/value rows
                pl.BlockSpec((1, 1, S), lambda b, qi: (b, 0, 0)),          # additive mask
                # TODO(synk): grid-invariant weight/bias blocks could be
                # single-buffered (pipeline_mode=pl.Buffered(1)) to halve VMEM.
                pl.BlockSpec((D, 3 * D), lambda b, qi: (0, 0)),            # [Wq|Wk|Wv]
                pl.BlockSpec((D, Dp), lambda b, qi: (0, 0)),               # Wo (padded)
                pl.BlockSpec((1, H, tq, S), lambda b, qi: (0, 0, qi, 0)),  # shared bias
            ],
            out_specs=pl.BlockSpec((1, tq, Dp), lambda b, qi: (b, qi, 0)),
        ),
        compiler_params=pltpu.CompilerParams(
            dimension_semantics=("parallel", "parallel"),
            vmem_limit_bytes=vmem_limit,
        ),
    )(x_in, x_in, mask_add, wqkv, wo_p, bias_in)

    attn_output = out_padded if Dp == D else out_padded[..., :D]
    return attn_output, returned_bias.astype(hidden_states.dtype)


# ---------------------------------------------------------------------------
# Pure-JAX reference (for a sanity check against the kernel)
# ---------------------------------------------------------------------------
def t5_attention_reference(hidden_states, wq, wk, wv, wo, position_bias, H):
    B, S, D = hidden_states.shape
    dh = D // H
    q = hidden_states @ wq
    k = hidden_states @ wk
    v = hidden_states @ wv
    q = q.reshape(B, S, H, dh).transpose(0, 2, 1, 3)
    k = k.reshape(B, S, H, dh).transpose(0, 2, 1, 3)
    v = v.reshape(B, S, H, dh).transpose(0, 2, 1, 3)
    scores = jnp.einsum("bhqd,bhkd->bhqk", q, k) + position_bias
    attn = jax.nn.softmax(scores, axis=-1)
    ctx = jnp.einsum("bhqk,bhkd->bhqd", attn, v)
    ctx = ctx.transpose(0, 2, 1, 3).reshape(B, S, H * dh)
    return ctx @ wo


if __name__ == "__main__":
    cfg = SmallT5Config()
    B, S, D, H = 2, 8, cfg.d_model, cfg.num_heads

    key = jax.random.PRNGKey(0)
    kx, kq, kk, kv, ko, kr = jax.random.split(key, 6)

    hidden_states = jax.random.normal(kx, (B, S, D), dtype=jnp.float32)
    scale = 1.0 / math.sqrt(D)
    wq = jax.random.normal(kq, (D, D), dtype=jnp.float32) * scale
    wk = jax.random.normal(kk, (D, D), dtype=jnp.float32) * scale
    wv = jax.random.normal(kv, (D, D), dtype=jnp.float32) * scale
    wo = jax.random.normal(ko, (D, D), dtype=jnp.float32) * scale
    rel_emb = jax.random.normal(
        kr, (cfg.relative_attention_num_buckets, H), dtype=jnp.float32) * 0.1

    attn_out, pos_bias = t5_attention_forward(hidden_states, wq, wk, wv, wo, rel_emb, cfg)
    attn_out = jax.block_until_ready(attn_out)

    ref = t5_attention_reference(hidden_states, wq, wk, wv, wo, pos_bias, H)
    # Kernel deliberately feeds the MXU bf16 operands (f32 accumulation), so the
    # tolerance covers bf16 rounding of inputs/intermediates; a structural bug
    # (wrong packed-weight layout, bias, softmax, head order) would blow way past this.
    assert jnp.allclose(attn_out, ref, rtol=1e-1, atol=1e-1), "mismatch vs reference"

    print("KERNEL_OK")
</pallas_src>

<mosaic_0001>
module attributes {stable_mosaic.version = 11 : i64} {
  func.func @t5_attention_kernel(%arg0: i32, %arg1: i32, %arg2: memref<1x8x32xbf16, #tpu.memory_space<vmem>>, %arg3: memref<1x8x32xbf16, #tpu.memory_space<vmem>>, %arg4: memref<1x1x8xf32, #tpu.memory_space<vmem>>, %arg5: memref<32x96xbf16, #tpu.memory_space<vmem>>, %arg6: memref<32x128xbf16, #tpu.memory_space<vmem>>, %arg7: memref<1x4x8x8xbf16, #tpu.memory_space<vmem>>, %arg8: memref<1x8x128xf32, #tpu.memory_space<vmem>>) attributes {dimension_semantics = [#tpu.dimension_semantics<parallel>, #tpu.dimension_semantics<parallel>], iteration_bounds = array<i64: 2, 1>, scalar_prefetch = 0 : i64, scratch_operands = 0 : i64, tpu.core_type = #tpu.core_type<tc>, window_params = [{transform_indices = @transform_0, window_bounds = array<i64: 1, 8, 32>}, {transform_indices = @transform_1, window_bounds = array<i64: 1, 8, 32>}, {transform_indices = @transform_2, window_bounds = array<i64: 1, 1, 8>}, {pipeline_mode = #tpu.pipeline_mode<synchronous>, transform_indices = @transform_3, window_bounds = array<i64: 32, 96>}, {pipeline_mode = #tpu.pipeline_mode<synchronous>, transform_indices = @transform_4, window_bounds = array<i64: 32, 128>}, {transform_indices = @transform_5, window_bounds = array<i64: 1, 4, 8, 8>}, {transform_indices = @transform_6, window_bounds = array<i64: 1, 8, 128>}]} {
    %c0 = arith.constant 0 : index
    %c0_0 = arith.constant 0 : index
    %c0_1 = arith.constant 0 : index
    %0 = vector.load %arg2[%c0, %c0_0, %c0_1] : memref<1x8x32xbf16, #tpu.memory_space<vmem>>, vector<1x8x32xbf16>
    %1 = vector.shape_cast %0 : vector<1x8x32xbf16> to vector<8x32xbf16>
    %c0_2 = arith.constant 0 : index
    %c0_3 = arith.constant 0 : index
    %c0_4 = arith.constant 0 : index
    %2 = vector.load %arg3[%c0_2, %c0_3, %c0_4] : memref<1x8x32xbf16, #tpu.memory_space<vmem>>, vector<1x8x32xbf16>
    %3 = vector.shape_cast %2 : vector<1x8x32xbf16> to vector<8x32xbf16>
    %c0_5 = arith.constant 0 : index
    %c0_6 = arith.constant 0 : index
    %4 = vector.load %arg5[%c0_5, %c0_6] : memref<32x96xbf16, #tpu.memory_space<vmem>>, vector<32x96xbf16>
    %c0_7 = arith.constant 0 : index
    %c0_8 = arith.constant 0 : index
    %5 = vector.load %arg6[%c0_7, %c0_8] : memref<32x128xbf16, #tpu.memory_space<vmem>>, vector<32x128xbf16>
    %c0_9 = arith.constant 0 : index
    %c0_10 = arith.constant 0 : index
    %c0_11 = arith.constant 0 : index
    %6 = vector.load %arg4[%c0_9, %c0_10, %c0_11] : memref<1x1x8xf32, #tpu.memory_space<vmem>>, vector<1x1x8xf32>
    %7 = vector.shape_cast %6 : vector<1x1x8xf32> to vector<1x8xf32>
    %8 = vector.extract_strided_slice %4 {offsets = [0, 0], sizes = [32, 32], strides = [1, 1]} : vector<32x96xbf16> to vector<32x32xbf16>
    %cst = arith.constant dense<0.000000e+00> : vector<8x32xf32>
    %9 = tpu.matmul %1, %8, %cst {dimension_numbers = #tpu.dot_dimension_numbers<[1], [0], [0], [1], [0, 0, 1, 1], [], []>} : vector<8x32xbf16>, vector<32x32xbf16>, vector<8x32xf32> -> vector<8x32xf32>
    %10 = vector.extract_strided_slice %4 {offsets = [0, 32], sizes = [32, 64], strides = [1, 1]} : vector<32x96xbf16> to vector<32x64xbf16>
    %cst_12 = arith.constant dense<0.000000e+00> : vector<8x64xf32>
    %11 = tpu.matmul %3, %10, %cst_12 {dimension_numbers = #tpu.dot_dimension_numbers<[1], [0], [0], [1], [0, 0, 1, 1], [], []>} : vector<8x32xbf16>, vector<32x64xbf16>, vector<8x64xf32> -> vector<8x64xf32>
    %12 = arith.truncf %9 : vector<8x32xf32> to vector<8x32xbf16>
    %13 = vector.extract_strided_slice %11 {offsets = [0, 0], sizes = [8, 32], strides = [1, 1]} : vector<8x64xf32> to vector<8x32xf32>
    %14 = arith.truncf %13 : vector<8x32xf32> to vector<8x32xbf16>
    %15 = vector.extract_strided_slice %11 {offsets = [0, 32], sizes = [8, 32], strides = [1, 1]} : vector<8x64xf32> to vector<8x32xf32>
    %16 = arith.truncf %15 : vector<8x32xf32> to vector<8x32xbf16>
    %17 = vector.extract_strided_slice %12 {offsets = [0, 0], sizes = [8, 8], strides = [1, 1]} : vector<8x32xbf16> to vector<8x8xbf16>
    %18 = vector.extract_strided_slice %14 {offsets = [0, 0], sizes = [8, 8], strides = [1, 1]} : vector<8x32xbf16> to vector<8x8xbf16>
    "tpu.trace_start"() <{level = 10 : i32, message = "qd,kd->qk"}> : () -> ()
    %cst_13 = arith.constant dense<0.000000e+00> : vector<8x8xf32>
    %19 = tpu.matmul %17, %18, %cst_13 {dimension_numbers = #tpu.dot_dimension_numbers<[1], [1], [0], [0], [0, 0, 1, 0], [], []>} : vector<8x8xbf16>, vector<8x8xbf16>, vector<8x8xf32> -> vector<8x8xf32>
    "tpu.trace_stop"() : () -> ()
    %c0_14 = arith.constant 0 : index
    %c0_15 = arith.constant 0 : index
    %c0_16 = arith.constant 0 : index
    %c0_17 = arith.constant 0 : index
    %20 = vector.load %arg7[%c0_14, %c0_15, %c0_16, %c0_17] : memref<1x4x8x8xbf16, #tpu.memory_space<vmem>>, vector<1x1x8x8xbf16>
    %21 = vector.shape_cast %20 : vector<1x1x8x8xbf16> to vector<8x8xbf16>
    %22 = arith.extf %21 : vector<8x8xbf16> to vector<8x8xf32>
    %23 = arith.addf %19, %22 : vector<8x8xf32>
    %24 = vector.broadcast %7 : vector<1x8xf32> to vector<8x8xf32>
    %25 = arith.addf %23, %24 : vector<8x8xf32>
    %cst_18 = arith.constant dense<0xFF800000> : vector<8xf32>
    %26 = vector.multi_reduction <maximumf>, %25, %cst_18 [1] : vector<8x8xf32> to vector<8xf32>
    %27 = vector.shape_cast %26 : vector<8xf32> to vector<8x1xf32>
    %28 = vector.broadcast %27 : vector<8x1xf32> to vector<8x8xf32>
    %29 = arith.subf %25, %28 : vector<8x8xf32>
    %30 = math.exp %29 : vector<8x8xf32>
    %cst_19 = arith.constant dense<0.000000e+00> : vector<8xf32>
    %31 = vector.multi_reduction <add>, %30, %cst_19 [1] : vector<8x8xf32> to vector<8xf32>
    %32 = vector.shape_cast %31 : vector<8xf32> to vector<8x1xf32>
    %33 = tpu.reciprocal %32 {approx = true} : vector<8x1xf32> -> vector<8x1xf32>
    %34 = vector.broadcast %33 : vector<8x1xf32> to vector<8x8xf32>
    %35 = arith.mulf %30, %34 : vector<8x8xf32>
    %36 = arith.truncf %35 : vector<8x8xf32> to vector<8x8xbf16>
    %37 = vector.extract_strided_slice %16 {offsets = [0, 0], sizes = [8, 8], strides = [1, 1]} : vector<8x32xbf16> to vector<8x8xbf16>
    %cst_20 = arith.constant dense<0.000000e+00> : vector<8x8xf32>
    %38 = tpu.matmul %36, %37, %cst_20 {dimension_numbers = #tpu.dot_dimension_numbers<[1], [0], [0], [1], [0, 0, 1, 1], [], []>} : vector<8x8xbf16>, vector<8x8xbf16>, vector<8x8xf32> -> vector<8x8xf32>
    %39 = vector.extract_strided_slice %12 {offsets = [0, 8], sizes = [8, 8], strides = [1, 1]} : vector<8x32xbf16> to vector<8x8xbf16>
    %40 = vector.extract_strided_slice %14 {offsets = [0, 8], sizes = [8, 8], strides = [1, 1]} : vector<8x32xbf16> to vector<8x8xbf16>
    "tpu.trace_start"() <{level = 10 : i32, message = "qd,kd->qk"}> : () -> ()
    %cst_21 = arith.constant dense<0.000000e+00> : vector<8x8xf32>
    %41 = tpu.matmul %39, %40, %cst_21 {dimension_numbers = #tpu.dot_dimension_numbers<[1], [1], [0], [0], [0, 0, 1, 0], [], []>} : vector<8x8xbf16>, vector<8x8xbf16>, vector<8x8xf32> -> vector<8x8xf32>
    "tpu.trace_stop"() : () -> ()
    %c0_22 = arith.constant 0 : index
    %c1 = arith.constant 1 : index
    %c0_23 = arith.constant 0 : index
    %c0_24 = arith.constant 0 : index
    %42 = vector.load %arg7[%c0_22, %c1, %c0_23, %c0_24] : memref<1x4x8x8xbf16, #tpu.memory_space<vmem>>, vector<1x1x8x8xbf16>
    %43 = vector.shape_cast %42 : vector<1x1x8x8xbf16> to vector<8x8xbf16>
    %44 = arith.extf %43 : vector<8x8xbf16> to vector<8x8xf32>
    %45 = arith.addf %41, %44 : vector<8x8xf32>
    %46 = vector.broadcast %7 : vector<1x8xf32> to vector<8x8xf32>
    %47 = arith.addf %45, %46 : vector<8x8xf32>
    %cst_25 = arith.constant dense<0xFF800000> : vector<8xf32>
    %48 = vector.multi_reduction <maximumf>, %47, %cst_25 [1] : vector<8x8xf32> to vector<8xf32>
    %49 = vector.shape_cast %48 : vector<8xf32> to vector<8x1xf32>
    %50 = vector.broadcast %49 : vector<8x1xf32> to vector<8x8xf32>
    %51 = arith.subf %47, %50 : vector<8x8xf32>
    %52 = math.exp %51 : vector<8x8xf32>
    %cst_26 = arith.constant dense<0.000000e+00> : vector<8xf32>
    %53 = vector.multi_reduction <add>, %52, %cst_26 [1] : vector<8x8xf32> to vector<8xf32>
    %54 = vector.shape_cast %53 : vector<8xf32> to vector<8x1xf32>
    %55 = tpu.reciprocal %54 {approx = true} : vector<8x1xf32> -> vector<8x1xf32>
    %56 = vector.broadcast %55 : vector<8x1xf32> to vector<8x8xf32>
    %57 = arith.mulf %52, %56 : vector<8x8xf32>
    %58 = arith.truncf %57 : vector<8x8xf32> to vector<8x8xbf16>
    %59 = vector.extract_strided_slice %16 {offsets = [0, 8], sizes = [8, 8], strides = [1, 1]} : vector<8x32xbf16> to vector<8x8xbf16>
    %cst_27 = arith.constant dense<0.000000e+00> : vector<8x8xf32>
    %60 = tpu.matmul %58, %59, %cst_27 {dimension_numbers = #tpu.dot_dimension_numbers<[1], [0], [0], [1], [0, 0, 1, 1], [], []>} : vector<8x8xbf16>, vector<8x8xbf16>, vector<8x8xf32> -> vector<8x8xf32>
    %61 = vector.extract_strided_slice %12 {offsets = [0, 16], sizes = [8, 8], strides = [1, 1]} : vector<8x32xbf16> to vector<8x8xbf16>
    %62 = vector.extract_strided_slice %14 {offsets = [0, 16], sizes = [8, 8], strides = [1, 1]} : vector<8x32xbf16> to vector<8x8xbf16>
    "tpu.trace_start"() <{level = 10 : i32, message = "qd,kd->qk"}> : () -> ()
    %cst_28 = arith.constant dense<0.000000e+00> : vector<8x8xf32>
    %63 = tpu.matmul %61, %62, %cst_28 {dimension_numbers = #tpu.dot_dimension_numbers<[1], [1], [0], [0], [0, 0, 1, 0], [], []>} : vector<8x8xbf16>, vector<8x8xbf16>, vector<8x8xf32> -> vector<8x8xf32>
    "tpu.trace_stop"() : () -> ()
    %c0_29 = arith.constant 0 : index
    %c2 = arith.constant 2 : index
    %c0_30 = arith.constant 0 : index
    %c0_31 = arith.constant 0 : index
    %64 = vector.load %arg7[%c0_29, %c2, %c0_30, %c0_31] : memref<1x4x8x8xbf16, #tpu.memory_space<vmem>>, vector<1x1x8x8xbf16>
    %65 = vector.shape_cast %64 : vector<1x1x8x8xbf16> to vector<8x8xbf16>
    %66 = arith.extf %65 : vector<8x8xbf16> to vector<8x8xf32>
    %67 = arith.addf %63, %66 : vector<8x8xf32>
    %68 = vector.broadcast %7 : vector<1x8xf32> to vector<8x8xf32>
    %69 = arith.addf %67, %68 : vector<8x8xf32>
    %cst_32 = arith.constant dense<0xFF800000> : vector<8xf32>
    %70 = vector.multi_reduction <maximumf>, %69, %cst_32 [1] : vector<8x8xf32> to vector<8xf32>
    %71 = vector.shape_cast %70 : vector<8xf32> to vector<8x1xf32>
    %72 = vector.broadcast %71 : vector<8x1xf32> to vector<8x8xf32>
    %73 = arith.subf %69, %72 : vector<8x8xf32>
    %74 = math.exp %73 : vector<8x8xf32>
    %cst_33 = arith.constant dense<0.000000e+00> : vector<8xf32>
    %75 = vector.multi_reduction <add>, %74, %cst_33 [1] : vector<8x8xf32> to vector<8xf32>
    %76 = vector.shape_cast %75 : vector<8xf32> to vector<8x1xf32>
    %77 = tpu.reciprocal %76 {approx = true} : vector<8x1xf32> -> vector<8x1xf32>
    %78 = vector.broadcast %77 : vector<8x1xf32> to vector<8x8xf32>
    %79 = arith.mulf %74, %78 : vector<8x8xf32>
    %80 = arith.truncf %79 : vector<8x8xf32> to vector<8x8xbf16>
    %81 = vector.extract_strided_slice %16 {offsets = [0, 16], sizes = [8, 8], strides = [1, 1]} : vector<8x32xbf16> to vector<8x8xbf16>
    %cst_34 = arith.constant dense<0.000000e+00> : vector<8x8xf32>
    %82 = tpu.matmul %80, %81, %cst_34 {dimension_numbers = #tpu.dot_dimension_numbers<[1], [0], [0], [1], [0, 0, 1, 1], [], []>} : vector<8x8xbf16>, vector<8x8xbf16>, vector<8x8xf32> -> vector<8x8xf32>
    %83 = vector.extract_strided_slice %12 {offsets = [0, 24], sizes = [8, 8], strides = [1, 1]} : vector<8x32xbf16> to vector<8x8xbf16>
    %84 = vector.extract_strided_slice %14 {offsets = [0, 24], sizes = [8, 8], strides = [1, 1]} : vector<8x32xbf16> to vector<8x8xbf16>
    "tpu.trace_start"() <{level = 10 : i32, message = "qd,kd->qk"}> : () -> ()
    %cst_35 = arith.constant dense<0.000000e+00> : vector<8x8xf32>
    %85 = tpu.matmul %83, %84, %cst_35 {dimension_numbers = #tpu.dot_dimension_numbers<[1], [1], [0], [0], [0, 0, 1, 0], [], []>} : vector<8x8xbf16>, vector<8x8xbf16>, vector<8x8xf32> -> vector<8x8xf32>
    "tpu.trace_stop"() : () -> ()
    %c0_36 = arith.constant 0 : index
    %c3 = arith.constant 3 : index
    %c0_37 = arith.constant 0 : index
    %c0_38 = arith.constant 0 : index
    %86 = vector.load %arg7[%c0_36, %c3, %c0_37, %c0_38] : memref<1x4x8x8xbf16, #tpu.memory_space<vmem>>, vector<1x1x8x8xbf16>
    %87 = vector.shape_cast %86 : vector<1x1x8x8xbf16> to vector<8x8xbf16>
    %88 = arith.extf %87 : vector<8x8xbf16> to vector<8x8xf32>
    %89 = arith.addf %85, %88 : vector<8x8xf32>
    %90 = vector.broadcast %7 : vector<1x8xf32> to vector<8x8xf32>
    %91 = arith.addf %89, %90 : vector<8x8xf32>
    %cst_39 = arith.constant dense<0xFF800000> : vector<8xf32>
    %92 = vector.multi_reduction <maximumf>, %91, %cst_39 [1] : vector<8x8xf32> to vector<8xf32>
    %93 = vector.shape_cast %92 : vector<8xf32> to vector<8x1xf32>
    %94 = vector.broadcast %93 : vector<8x1xf32> to vector<8x8xf32>
    %95 = arith.subf %91, %94 : vector<8x8xf32>
    %96 = math.exp %95 : vector<8x8xf32>
    %cst_40 = arith.constant dense<0.000000e+00> : vector<8xf32>
    %97 = vector.multi_reduction <add>, %96, %cst_40 [1] : vector<8x8xf32> to vector<8xf32>
    %98 = vector.shape_cast %97 : vector<8xf32> to vector<8x1xf32>
    %99 = tpu.reciprocal %98 {approx = true} : vector<8x1xf32> -> vector<8x1xf32>
    %100 = vector.broadcast %99 : vector<8x1xf32> to vector<8x8xf32>
    %101 = arith.mulf %96, %100 : vector<8x8xf32>
    %102 = arith.truncf %101 : vector<8x8xf32> to vector<8x8xbf16>
    %103 = vector.extract_strided_slice %16 {offsets = [0, 24], sizes = [8, 8], strides = [1, 1]} : vector<8x32xbf16> to vector<8x8xbf16>
    %cst_41 = arith.constant dense<0.000000e+00> : vector<8x8xf32>
    %104 = tpu.matmul %102, %103, %cst_41 {dimension_numbers = #tpu.dot_dimension_numbers<[1], [0], [0], [1], [0, 0, 1, 1], [], []>} : vector<8x8xbf16>, vector<8x8xbf16>, vector<8x8xf32> -> vector<8x8xf32>
    %105 = tpu.concatenate %38, %60, %82, %104 in 1 : vector<8x8xf32>, vector<8x8xf32>, vector<8x8xf32>, vector<8x8xf32> -> vector<8x32xf32>
    %106 = arith.truncf %105 : vector<8x32xf32> to vector<8x32xbf16>
    %cst_42 = arith.constant dense<0.000000e+00> : vector<8x128xf32>
    %107 = tpu.matmul %106, %5, %cst_42 {dimension_numbers = #tpu.dot_dimension_numbers<[1], [0], [0], [1], [0, 0, 1, 1], [], []>} : vector<8x32xbf16>, vector<32x128xbf16>, vector<8x128xf32> -> vector<8x128xf32>
    %c0_43 = arith.constant 0 : index
    %c0_44 = arith.constant 0 : index
    %c0_45 = arith.constant 0 : index
    %108 = vector.load %arg8[%c0_43, %c0_44, %c0_45] : memref<1x8x128xf32, #tpu.memory_space<vmem>>, vector<1x8x128xf32>
    %109 = vector.shape_cast %108 : vector<1x8x128xf32> to vector<8x128xf32>
    %110 = vector.shape_cast %107 : vector<8x128xf32> to vector<1x8x128xf32>
    tpu.vector_store %arg8[%c0_43, %c0_44, %c0_45], %110 {strides = array<i32>} : memref<1x8x128xf32, #tpu.memory_space<vmem>>, vector<1x8x128xf32>,
    return
  }
  func.func @transform_0(%arg0: i32, %arg1: i32) -> (i32, i32, i32) {
    %c0_i32 = arith.constant 0 : i32
    %c0_i32_0 = arith.constant 0 : i32
    return %arg0, %arg1, %c0_i32 : i32, i32, i32
  }
  func.func @transform_1(%arg0: i32, %arg1: i32) -> (i32, i32, i32) {
    %c0_i32 = arith.constant 0 : i32
    %c0_i32_0 = arith.constant 0 : i32
    %c0_i32_1 = arith.constant 0 : i32
    return %arg0, %c0_i32, %c0_i32_0 : i32, i32, i32
  }
  func.func @transform_2(%arg0: i32, %arg1: i32) -> (i32, i32, i32) {
    %c0_i32 = arith.constant 0 : i32
    %c0_i32_0 = arith.constant 0 : i32
    %c0_i32_1 = arith.constant 0 : i32
    return %arg0, %c0_i32, %c0_i32_0 : i32, i32, i32
  }
  func.func @transform_3(%arg0: i32, %arg1: i32) -> (i32, i32) {
    %c0_i32 = arith.constant 0 : i32
    %c0_i32_0 = arith.constant 0 : i32
    %c0_i32_1 = arith.constant 0 : i32
    return %c0_i32, %c0_i32_0 : i32, i32
  }
  func.func @transform_4(%arg0: i32, %arg1: i32) -> (i32, i32) {
    %c0_i32 = arith.constant 0 : i32
    %c0_i32_0 = arith.constant 0 : i32
    %c0_i32_1 = arith.constant 0 : i32
    return %c0_i32, %c0_i32_0 : i32, i32
  }
  func.func @transform_5(%arg0: i32, %arg1: i32) -> (i32, i32, i32, i32) {
    %c0_i32 = arith.constant 0 : i32
    %c0_i32_0 = arith.constant 0 : i32
    %c0_i32_1 = arith.constant 0 : i32
    %c0_i32_2 = arith.constant 0 : i32
    return %c0_i32, %c0_i32_0, %arg1, %c0_i32_1 : i32, i32, i32, i32
  }
  func.func @transform_6(%arg0: i32, %arg1: i32) -> (i32, i32, i32) {
    %c0_i32 = arith.constant 0 : i32
    %c0_i32_0 = arith.constant 0 : i32
    return %arg0, %arg1, %c0_i32 : i32, i32, i32
  }
}

</mosaic_0001>

<bundles_post_ra>
// kernel: tpu_custom_call.1
= control target key start
LH: loop header
LB: loop body
LE: loop exit
PB: predicated region body
PF: predicated region fallthrough
CT: control target
= control target key end

     0   :  { %s1703_s0 = inlined_call_operand.hbm [shape: bf16[2,8,32], index: 0, kind: input, shape index: {}]   ;;  %s1704_s1 = inlined_call_operand.hbm [shape: bf16[2,8,32], index: 1, kind: input, shape index: {}]   ;;  %s1705_s2 = inlined_call_operand.hbm [shape: f32[2,1,8], index: 2, kind: input, shape index: {}]   ;;  %s1706_s3 = inlined_call_operand.hbm [shape: bf16[32,96], index: 3, kind: input, shape index: {}]   ;;  %s1707_s4 = inlined_call_operand.hbm [shape: bf16[32,128], index: 4, kind: input, shape index: {}]   ;;  %s1708_s5 = inlined_call_operand.hbm [shape: bf16[1,4,8,8], index: 5, kind: input, shape index: {}]   ;;  %s1709_s6 = inlined_call_operand.hbm [shape: f32[2,8,128], index: 6, kind: output, shape index: {}]  }
   0x1   :  { %1721 = sst [smem:[#allocation25_spill]] %s1704_s1 }
   0x2   :  { %1722 = sst [smem:[#allocation26_spill]] %s1706_s3 }
   0x3   :  { %1723 = sst [smem:[#allocation27_spill]] %s1707_s4 }
   0x4   :  { %1724 = sst [smem:[#allocation28_spill]] %s1708_s5 }
   0x5   :  { %1725 = sst [smem:[#allocation29_spill]] %s1709_s6 }
   0x6   :  { %11 = vsyncpa [#allocation3], 0 }
   0x7   :  { %13 = vsyncpa [#allocation3 + $0x1], 0 }
   0x8   :  { %14 = vsyncpa [#allocation6], 0 }
   0x9   :  { %16 = vsyncpa [#allocation6 + $0x1], 0 }
   0xa   :  { %17 = vsyncpa [#allocation9], 0 }
   0xb   :  { %18 = vsyncpa [#allocation12], 0 }
   0xc   :  { %19 = vsyncpa [#allocation4], 0 }
   0xd   :  { %21 = vsyncpa [#allocation4 + $0x1], 0  ;;  %s1450_s21 = smov 0   ;;  %s1452_s22 = smov 0  }
   0xe   :  { %s1454_s23 = smov 0   ;;  %s1456_s24 = smov 0  }
   0xf   :  { %s1458_s25 = smov 0   ;;  %s1460_s26 = smov 0  }
  0x10 LB: > { %1726 = sst [smem:[#allocation19_spill]] %s1378_s21  ;;  %s1481_s27 = sadd.s32 4294967295, %s1398_s26   ;;  %s1398_s26 = sphi %s1460_s26, %s27_s26   ;;  %s1394_s25 = sphi %s1458_s25, %s1756_s25   ;;  %s1390_s24 = sphi %s1456_s24, %s1755_s24   ;;  %s1386_s23 = sphi %s1454_s23, %s1751_s23   ;;  %s1382_s22 = sphi %s1452_s22, %s1754_s22   ;;  %s1378_s21 = sphi %s1450_s21, %s1753_s21  }
  0x11   : > { %1727 = sst [smem:[#allocation20_spill]] %s1386_s23  ;;  %p941_p0 = scmp.ge.s32.totalorder %s1398_s26, 1 }
  0x12   : > { %1728 = sst [smem:[#allocation21_spill]] %s1398_s26  ;;  %p62_p1 = scmp.eq.s32.totalorder %s1481_s27, 0 }
  0x13   : > { %p220_p2 = scmp.lt.s32.totalorder %s1398_s26, 3  ;;  %s1729_s3 = sld [smem:[#allocation26_spill]] }
  0x14   : > { %s1400_s8 = smov [#allocation8]   ;;  %s1710_s11 = smov 64  }
  0x15   : > { %p1489_p3 = pnand %p941_p0, %p220_p2  ;;  %s233_s9 = sshll.u32 %s1400_s8, 4  ;;  %s234_s9 = int_to_ptr.vmem [resolvable:$true] %s233_s9 }
  0x16   : > { %s1712_s12 = smov 4   ;;  %s940_s13 = sadd.s32 4294967294, %s1398_s26  }
  0x17   : > { %p1012_p4 = pneg %p1489_p3  ;;  %s39_s14 = sadd.s32 1, %s1394_s25 }
  0x18   : > { %s48_s15 = sadd.s32 1, %s1386_s23  ;;  %p41_p7 = scmp.ge.s32.totalorder %s39_s14, 2 }
  0x19   : > { %s231_s30 = sshll.u32 %s1729_s3, 4  ;;  %p1497_p5 = pnand %p1012_p4, %p62_p1  ;;  %s232_s30 = int_to_ptr.hbm [resolvable:$true] %s231_s30 }
  0x1a   : > { %p55_p8 = scmp.ne.s32.totalorder %s1386_s23, %s1382_s22  ;;  %p56_p9 = scmp.eq.s32.totalorder %s1398_s26, 0 }
  0x1b   : > { %1015 = dma.hbm_to_vmem [thread:$0]  (!%p1497_p5), %s232_s30, 256, %s234_s9, [#allocation9], %s1710_s11, %s1710_s11, %s1712_s12  }
  0x1c   : > { %p61_p10 = scmp.ne.s32.totalorder %s1382_s22, %s1378_s21  ;;  %s1758_s14 = smov (%p41_p7, %s39_s14), 0 }
  0x1d   : > { %1732 = sst [smem:[#allocation22_spill]] %s1758_s14  ;;  %p1517_p11 = por %p56_p9, %p55_p8 }
  0x1e   : > { %p1523_p12 = por %p62_p1, %p61_p10  ;;  %s43_s18 = ssub.s32 %s1394_s25, %s1758_s14 }
  0x1f   : > { %p207_p13 = scmp.eq.s32.totalorder %s1481_s27, 1  ;;  %p46_p0 = scmp.eq.s32.totalorder %s43_s18, 0 }
  0x20   : > { %p213_p2 = scmp.eq.s32.totalorder %s940_s13, 1  ;;  %p1039_p7 = scmp.lt.s32.totalorder %s1398_s26, 2 }
  0x21   : > { %p1530_p4 = por %p207_p13, %p55_p8  ;;  %s1543_s29 = sand.u32 1, %s1386_s23  }
  0x22   : > { %s1536_s20 = scalar_select %p46_p0, %s1386_s23, %s48_s15  }
  0x23   : > { %p1538_p9 = por %p213_p2, %p61_p10  ;;  %s946_s30 = sshll.u32 %s1543_s29, 2 }
  0x24   : > { %1736 = sst [smem:[#allocation23_spill]] %s1536_s20  ;;  %s947_s8 = sshll.u32 %s1394_s25, 2 }
  0x25   : > { %s1737_s28 = scalar_select %p1538_p9, 1, 0 }
  0x26   : > { %p1549_p6 = pnand %p1039_p7, %p1517_p11  ;;  %s297_s13 = sand.u32 1, %s1398_s26  }
  0x27   : > { %1738 = sst [smem:[#allocation24_spill]] %s1737_s28  ;;  %s301_s3 = scalar_lea.vmem [#allocation5], %s946_s30 }
  0x28   : > { %s1740_s1 = sld [smem:[#allocation25_spill]]  ;;  %s309_s14 = sshll.u32 %s301_s3, 4  ;;  %s310_s14 = int_to_ptr.vmem [resolvable:$true] %s309_s14 }
  0x29   : > { %s1557_s20 = scalar_lea.sflag [#allocation6], %s297_s13  ;;  %s1741_s4 = sld [smem:[#allocation27_spill]] }
  0x2a   : > { %s1403_s26 = smov [#allocation10]   ;;  %s1742_s5 = sld [smem:[#allocation28_spill]] }
  0x2b   : > { %s247_s18 = sshll.u32 %s1403_s26, 4  ;;  %s1743_s13 = smov 4   ;;  %s248_s18 = int_to_ptr.vmem [resolvable:$true] %s247_s18 }
  0x2c   : > { %s1404_s23 = smov [#allocation11]   ;;  %s286_s16 = scalar_lea.hbm %s1703_s0, %s947_s8 }
  0x2e   : > { %s305_s11 = scalar_lea.hbm %s1740_s1, %s947_s8  ;;  %s1744_s1 = smov 64  }
  0x2f   : > { %s307_s12 = sshll.u32 %s305_s11, 4  ;;  %s245_s28 = sshll.u32 %s1741_s4, 4  ;;  %s308_s12 = int_to_ptr.hbm [resolvable:$true] %s307_s12  ;;  %s246_s28 = int_to_ptr.hbm [resolvable:$true] %s245_s28 }
  0x30   : > { %1028 = dma.hbm_to_vmem [thread:$0]  (!%p1549_p6), %s308_s12, 64, %s310_s14, %s1557_s20  }
  0x31   : > { %s261_s15 = sshll.u32 %s1742_s5, 4  ;;  %s263_s12 = sshll.u32 %s1404_s23, 4  ;;  %s262_s15 = int_to_ptr.hbm [resolvable:$true] %s261_s15  ;;  %s264_s12 = int_to_ptr.vmem [resolvable:$true] %s263_s12 }
  0x32   : > { %1018 = dma.hbm_to_vmem [thread:$0]  (!%p1497_p5), %s246_s28, 256, %s248_s18, [#allocation9], %s1744_s1, %s1744_s1, %s1743_s13  }
  0x33   : > { %1021 = dma.hbm_to_vmem [thread:$0]  (!%p1497_p5), %s262_s15, 256, %s264_s12, [#allocation12], %s1744_s1, %s1744_s1, %s1743_s13  }
  0x34   : > { %s281_s11 = scalar_lea.vmem [#allocation2], %s946_s30  ;;  %s288_s4 = sshll.u32 %s286_s16, 4  ;;  %s289_s4 = int_to_ptr.hbm [resolvable:$true] %s288_s4 }
  0x35   : > { %s290_s3 = sshll.u32 %s281_s11, 4  ;;  %s278_s28 = scalar_lea.sflag [#allocation3], %s1543_s29  ;;  %s291_s3 = int_to_ptr.vmem [resolvable:$true] %s290_s3 }
  0x36   : > { %1025 = dma.hbm_to_vmem [thread:$0]  (!%p1549_p6), %s289_s4, 64, %s291_s3, %s278_s28  }
  0x37   : > { %s322_s23 = scalar_lea.hbm %s1705_s2, %s1394_s25  ;;  %s319_s5 = scalar_lea.vmem [#allocation7], %s1543_s29 }
  0x38   : > { %s326_s21 = sshll.u32 %s319_s5, 4  ;;  %s324_s6 = sshll.u32 %s322_s23, 4  ;;  %s327_s21 = int_to_ptr.vmem [resolvable:$true] %s326_s21  ;;  %s325_s6 = int_to_ptr.hbm [resolvable:$true] %s324_s6 }
  0x39   : > { %1031 = dma.hbm_to_vmem [thread:$0]  (!%p1549_p6), %s325_s6, 16, %s327_s21, %s1557_s20  }
  0x3a   : > { %335 = sbr.rel (%p1489_p3) target bundleno = 1545 (0x609), region = 44  ;;  %s1595_s1 = sand.u32 (!%p1489_p3), 1, %s1382_s22  }
  0x3b   : > { %s951_s4 = sshll.u32 (!%p1489_p3), %s1595_s1, 2  ;;  %s338_s30 = scalar_lea.sflag (!%p1489_p3), [#allocation3], %s1595_s1 }
  0x3c   : > { %s341_s8 = scalar_lea.vmem (!%p1489_p3), [#allocation2], %s951_s4 }
  0x3f   : > { %1357 = dma.done.wait (%p1523_p12), %s338_s30, 64  }
  0x40   : > { %1359 = vsyncadd (%p1523_p12), %s338_s30, 4294967232  ;;  %s347_s5 = sand.u32 1, %s1481_s27   ;;  %s351_s21 = scalar_lea.vmem [#allocation5], %s951_s4 }
  0x41   : > { %s348_s6 = scalar_lea.sflag [#allocation6], %s347_s5 }
  0x42   : > { %1361 = dma.done.wait (%p1523_p12), %s348_s6, 80  }
  0x43   : > { %1363 = vsyncadd (%p1523_p12), %s348_s6, 4294967216  ;;  %s360_s7 = scalar_lea.vmem [#allocation7], %s1595_s1 }
  0x44   : > { %1365 = dma.done.wait (%p62_p1), [#allocation9], 512  }
  0x45   : > { %1367 = vsyncadd (%p62_p1), [#allocation9], 4294966784 }
  0x46   : > { %1369 = dma.done.wait (%p62_p1), [#allocation12], 256  }
  0x47   : > { %1371 = vsyncadd (%p62_p1), [#allocation12], 4294967040  ;;  %v989_v0 = vld [vmem:[#allocation8 + $0x8] sm:$0xff]  ;;  %s1405_s20 = smov 96   ;;  %v988_v1 = vld [vmem:[#allocation8] sm:$0xff]  ;;  %vm438_vm0 = vcmask 261120  }
  0x48   : > { %457 = vrot.lane.b32.xlu0 %v989_v0, %s1405_s20  ;;  %448 = vmatpush.bf16.msra.mxu0 %v989_v0  ;;  %v415_v2 = vld [vmem:[%s341_s8] sm:$0xf]  ;;  %v416_v5 = vld [vmem:[%s351_s21] sm:$0xf]  ;;  %s1406_s27 = smov 120   ;;  %s1407_s17 = smov 112  }
  0x49   : > { %vm481_vm1 = vcmask 64512   ;;  %s1408_s29 = smov 104   ;;  %vm525_vm2 = vcmask 1043456   ;;  %v479_v21 = vld [vmem:[#allocation11] sm:$0xff]   ;;  %v1107_v23 = vld [vmem:[%s360_s7] ss:$0 sm:$0xff] }
  0x4a   : > { %v480_v22 = vunpack.c.l.bf16 %v479_v21  ;;  %v606_v47 = vld [vmem:[#allocation11 + $0x8] sm:$0xff]   ;;  %v544_v49 = vunpack.c.h.bf16 %v479_v21  ;;  %s1409_s9 = smov 88   ;;  %s1410_s15 = smov 80   ;;  %vm738_vm3 = vcmask 130048   ;;  %vm740_vm4 = vcmask 195584  }
  0x4b   : > { %v607_v48 = vunpack.c.l.bf16 %v606_v47  ;;  %v667_v60 = vunpack.c.h.bf16 %v606_v47  ;;  %s1411_s13 = smov 72   ;;  %s1412_s12 = smov 16  }
  0x4c   : > { %449 = vmatpush.bf16.msra.mxu0 %v988_v1  ;;  %s1413_s26 = smov 8   ;;  %s1414_s14 = smov 24  }
  0x4d   : > { %s985_s16 = sshll.u32 %s1390_s24, 3  ;;  %s956_s11 = sshll.u32 %s1595_s1, 3 }
  0x4e   : > { %s1745_s18 = sld [smem:[#allocation29_spill]]  ;;  %s413_s23 = scalar_lea.vmem [#allocation13], %s956_s11 }
  0x4f   : > { %965 = vmatmul.msk.bf16.vlgmr.msra.gmra.mxu0 %vm438_vm0, %v415_v2  ;;  %s786_s4 = sshll.u32 %s413_s23, 4  ;;  %s773_s8 = scalar_lea.sflag [#allocation4], %s1595_s1  ;;  %s787_s4 = int_to_ptr.vmem [resolvable:$true] %s786_s4 }
  0x50   : > { %455 = vrot.lane.b32.xlu0 %v988_v1, %s1405_s20 }
  0x54   : > { %s784_s10 = scalar_lea.hbm %s1745_s18, %s985_s16  ;;  %s1324_s7 = scalar_lea.hbm %s1745_s18, 16 }
  0x55   : > { %s788_s30 = sshll.u32 %s784_s10, 4  ;;  %s789_s30 = int_to_ptr.hbm [resolvable:$true] %s788_s30 }
  0x56   : > { %s1318_s5 = sshra.s32 %s789_s30, 4  ;;  %s1319_s5 = int_to_ptr.hbm [resolvable:$true] %s1318_s5 }
  0x57   : > { %s1320_s6 = scalar_lea.hbm %s1319_s5, 8  ;;  %p1325_p6 = scmp.lt.s32.totalorder %s1319_s5, %s1745_s18 }
  0x58   : > { %p1321_p1 = scmp.ne.s32.totalorder %s1319_s5, %s1320_s6  ;;  %p1326_p8 = scmp.lt.s32.totalorder %s1324_s7, %s1320_s6 }
  0x5a   : > { %p1322_p3 = pnand %p1321_p1, %p1530_p4  ;;  %p1327_p10 = por %p1326_p8, %p1325_p6 }
  0x5c   : > { %p1323_p5 = pneg %p1322_p3 }
  0x5e   : > { %p1328_p11 = pnand %p1327_p10, %p1323_p5 }
  0xba   : > { %v458_v3 = vpop.permute.xlu0 %457 }
  0xbb   : > { %470 = vmatpush.bf16.msra.mxu1 %v458_v3 }
  0xc2   : > { %v456_v4 = vpop.permute.xlu0 %455 }
  0xc3   : > { %471 = vmatpush.bf16.msra.mxu1 %v456_v4 }
  0xc6   : > { %966 = vmatmul.msk.bf16.vlgmr.msra.gmra.mxu1 %vm438_vm0, %v416_v5 }
  0xcc   : > { %v451_v6 = vpop.f32.mrf.mxu0 }
  0xcd   : > { %v477_v7 = vpack.c.bf16 %v451_v6, %v451_v6 }
  0xcf   : > { %v546_v8 = vunpack.c.l.b16 %v477_v7 }
  0xd1   : > { %v547_v9 = vpack.c.b16 %v546_v8, %v546_v8 }
  0xd3   : > { %548 = vrot.lane.b32.xlu0 %v547_v9, %s1406_s27 }
  0xd4   : > { %v453_v10 = vpop.f32.mrf.mxu0 }
  0xdb   : > { %608 = vrot.lane.b32.xlu0 %v547_v9, %s1407_s17 }
 0x143   : > { %v473_v11 = vpop.f32.mrf.mxu1 }
 0x144   : > { %v478_v12 = vpack.c.bf16 %v473_v11, %v473_v11 }
 0x145   : > { %v549_v40 = vpop.permute.xlu0 %548 }
 0x146   : > { %v518_v13 = vunpack.c.l.b16 %v478_v12  ;;  %v486_v14 = vsel %vm481_vm1, %v478_v12, 0 }
 0x147   : > { %495 = vmatpush.bf16.xpose.msra.mxu2 %v486_v14 }
 0x148   : > { %v1623_v15 = vpack.c.b16 %v518_v13, %v518_v13 }
 0x14a   : > { %520 = vrot.lane.b32.xlu2 %v1623_v15, %s1405_s20 }
 0x14b   : > { %v475_v16 = vpop.f32.mrf.mxu1 }
 0x14d   : > { %v609_v43 = vpop.permute.xlu0 %608 }
 0x14e   : > { %967 = vmatmul.msk.bf16.vlgmr.msra.gmra.mxu2 %vm481_vm1, %v477_v7 }
 0x152   : > { %550 = vrot.lane.b32.xlu2 %v1623_v15, %s1406_s27 }
 0x15a   : > { %670 = vrot.lane.b32.xlu2 %v1623_v15, %s1408_s29 }
 0x162   : > { %668 = vrot.lane.b32.xlu2 %v547_v9, %s1408_s29 }
 0x1a4   : > { %v521_v17 = vpop.permute.xlu2 %520 }
 0x1a5   : > { %v527_v18 = vsel %vm525_vm2, %v521_v17, 0 }
 0x1a6   : > { %536 = vmatpush.bf16.msra.mxu3 %v527_v18 }
 0x1ac   : > { %v551_v19 = vpop.permute.xlu2 %550 }
 0x1ad   : > { %v556_v20 = vsel %vm481_vm1, %v551_v19, 0 }
 0x1ae   : > { %565 = vmatpush.bf16.xpose.msrb.mxu3 %v556_v20 }
 0x1b4   : > { %v671_v37 = vpop.permute.xlu2 %670 }
 0x1b5   : > { %v676_v39 = vsel %vm481_vm1, %v671_v37, 0 }
 0x1bc   : > { %v669_v44 = vpop.permute.xlu2 %668 }
 0x1d1   : > { %v497_v24 = vpop.f32.mrf.mxu2 }
 0x1d2   : > { %v498_v25 = vadd.f32 %v497_v24, %v480_v22 }
 0x1d4   : > { %v504_v26 = vadd.f32 %v1107_v23, %v498_v25 }
 0x1d6   : > { %v505_v27 = vsel %vm481_vm1, %v504_v26, -inf }
 0x1d7   : > { %506 = vmax.xlane.f32.xlu1 %v505_v27 }
 0x1d9   : > { %v499_v28 = vpop.f32.mrf.mxu2 }
 0x24a   : > { %v507_v29 = vpop.xlane.xlu1 %506 }
 0x24b   : > { %v508_v30 = vsub.f32 %v504_v26, %v507_v29 }
 0x24d   : > { %v509_v31 = vmul.f32 1.442695, %v508_v30 }
 0x24f   : > { %1108 = vpow2.f32 %v509_v31 }
 0x255   : > { %v1109_v32 = vpop.eup %1108 }
 0x256   : > { %v511_v33 = vsel %vm481_vm1, %v1109_v32, 0.0 }
 0x257   : > { %512 = vadd.xlane.f32.xlu1 %v511_v33 }
 0x270   : > { %610 = vrot.lane.b32.xlu1 %v1623_v15, %s1407_s17 }
 0x2ca   : > { %v513_v34 = vpop.xlane.xlu1 %512 }
 0x2cb   : > { %1110 = vrcp.f32 %v513_v34 }
 0x2d1   : > { %v1111_v35 = vpop.eup %1110 }
 0x2d2   : > { %v515_v36 = vmul.f32 %v1111_v35, %v1109_v32 }
 0x2d4   : > { %v516_v38 = vpack.c.bf16 %v515_v36, %v515_v36 }
 0x2d6   : > { %968 = vmatmul.msk.bf16.vlgmr.msra.gmra.mxu3 %vm481_vm1, %v516_v38 }
 0x2d7   : > { %685 = vmatpush.bf16.xpose.msra.mxu3 %v676_v39 }
 0x2e2   : > { %v611_v41 = vpop.permute.xlu1 %610 }
 0x2e3   : > { %v616_v42 = vsel %vm481_vm1, %v611_v41, 0  ;;  %v991_v41 = vld [vmem:[#allocation10 + $0x8] sm:$0xff] }
 0x2e4   : > { %625 = vmatpush.bf16.xpose.msrb.mxu1 %v616_v42  ;;  %v990_v42 = vld [vmem:[#allocation10] sm:$0xff] }
 0x2e6   : > { %969 = vmatmul.msk.bf16.vlgmr.msrb.gmra.mxu3 %vm481_vm1, %v549_v40 }
 0x2eb   : > { %971 = vmatmul.msk.bf16.vlgmr.msrb.gmra.mxu1 %vm481_vm1, %v609_v43 }
 0x2ec   : > { %764 = vmatpush.bf16.msra.mxu1 %v991_v41 }
 0x2f0   : > { %765 = vmatpush.bf16.msra.mxu1 %v990_v42 }
 0x2f6   : > { %973 = vmatmul.msk.bf16.vlgmr.msra.gmra.mxu3 %vm481_vm1, %v669_v44 }
 0x359   : > { %v1644_v45 = vpop.f32.mrf.mxu3 }
 0x361   : > { %v540_v46 = vpop.f32.mrf.mxu3 }
 0x368   : > { %v627_v50 = vpop.f32.mrf.mxu1 }
 0x369   : > { %v628_v51 = vadd.f32 %v627_v50, %v607_v48  ;;  %v567_v52 = vpop.f32.mrf.mxu3 }
 0x36a   : > { %v568_v53 = vadd.f32 %v567_v52, %v544_v49 }
 0x36b   : > { %v631_v54 = vadd.f32 %v1107_v23, %v628_v51 }
 0x36c   : > { %v571_v55 = vadd.f32 %v1107_v23, %v568_v53 }
 0x36d   : > { %v632_v56 = vsel %vm481_vm1, %v631_v54, -inf }
 0x36e   : > { %633 = vmax.xlane.f32.xlu2 %v632_v56  ;;  %v572_v57 = vsel %vm481_vm1, %v571_v55, -inf }
 0x36f   : > { %573 = vmax.xlane.f32.xlu0 %v572_v57 }
 0x370   : > { %v629_v58 = vpop.f32.mrf.mxu1 }
 0x371   : > { %v569_v59 = vpop.f32.mrf.mxu3 }
 0x379   : > { %v687_v61 = vpop.f32.mrf.mxu3 }
 0x37a   : > { %v688_v62 = vadd.f32 %v687_v61, %v667_v60 }
 0x37c   : > { %v691_v63 = vadd.f32 %v1107_v23, %v688_v62 }
 0x37e   : > { %v692_v0 = vsel %vm481_vm1, %v691_v63, -inf }
 0x37f   : > { %693 = vmax.xlane.f32.xlu1 %v692_v0 }
 0x381   : > { %v689_v1 = vpop.f32.mrf.mxu3 }
 0x383   : > { %584 = vrot.lane.b32.xlu0 %v1623_v15, %s1409_s9 }
 0x3e1   : > { %v634_v2 = vpop.xlane.xlu2 %633 }
 0x3e2   : > { %v635_v3 = vsub.f32 %v631_v54, %v634_v2  ;;  %v574_v4 = vpop.xlane.xlu0 %573 }
 0x3e3   : > { %v575_v6 = vsub.f32 %v571_v55, %v574_v4 }
 0x3e4   : > { %v636_v5 = vmul.f32 1.442695, %v635_v3 }
 0x3e5   : > { %v576_v7 = vmul.f32 1.442695, %v575_v6 }
 0x3e6   : > { %1112 = vpow2.f32 %v636_v5 }
 0x3e7   : > { %1114 = vpow2.f32 %v576_v7 }
 0x3ec   : > { %v1113_v8 = vpop.eup %1112 }
 0x3ed   : > { %v638_v9 = vsel %vm481_vm1, %v1113_v8, 0.0  ;;  %v1115_v10 = vpop.eup %1114 }
 0x3ee   : > { %639 = vadd.xlane.f32.xlu2 %v638_v9  ;;  %v578_v16 = vsel %vm481_vm1, %v1115_v10, 0.0 }
 0x3f2   : > { %v694_v11 = vpop.xlane.xlu1 %693 }
 0x3f3   : > { %v695_v12 = vsub.f32 %v691_v63, %v694_v11 }
 0x3f5   : > { %v696_v13 = vmul.f32 1.442695, %v695_v12  ;;  %v585_v14 = vpop.permute.xlu0 %584 }
 0x3f6   : > { %579 = vadd.xlane.f32.xlu2 %v578_v16  ;;  %v590_v17 = vsel %vm525_vm2, %v585_v14, 0 }
 0x3f7   : > { %1116 = vpow2.f32 %v696_v13  ;;  %599 = vmatpush.bf16.msrb.mxu0 %v590_v17 }
 0x3fd   : > { %v1117_v18 = vpop.eup %1116 }
 0x3fe   : > { %v698_v19 = vsel %vm481_vm1, %v1117_v18, 0.0 }
 0x3ff   : > { %699 = vadd.xlane.f32.xlu1 %v698_v19 }
 0x40e   : > { %644 = vrot.lane.b32.xlu2 %v1623_v15, %s1410_s15 }
 0x418   : > { %704 = vrot.lane.b32.xlu1 %v1623_v15, %s1411_s13 }
 0x461   : > { %v640_v20 = vpop.xlane.xlu2 %639 }
 0x462   : > { %1118 = vrcp.f32 %v640_v20 }
 0x468   : > { %v1119_v22 = vpop.eup %1118 }
 0x469   : > { %v580_v21 = vpop.xlane.xlu2 %579  ;;  %v642_v24 = vmul.f32 %v1119_v22, %v1113_v8 }
 0x46a   : > { %1120 = vrcp.f32 %v580_v21 }
 0x46b   : > { %v643_v29 = vpack.c.bf16 %v642_v24, %v642_v24 }
 0x470   : > { %v1121_v23 = vpop.eup %1120 }
 0x471   : > { %v582_v25 = vmul.f32 %v1121_v23, %v1115_v10  ;;  %v645_v26 = vpop.permute.xlu2 %644 }
 0x472   : > { %v650_v27 = vsel %vm525_vm2, %v645_v26, 0  ;;  %v700_v30 = vpop.xlane.xlu1 %699 }
 0x473   : > { %659 = vmatpush.bf16.msrb.mxu2 %v650_v27  ;;  %v583_v28 = vpack.c.bf16 %v582_v25, %v582_v25  ;;  %1122 = vrcp.f32 %v700_v30 }
 0x475   : > { %970 = vmatmul.msk.bf16.vlgmr.msrb.gmra.mxu0 %vm481_vm1, %v583_v28 }
 0x476   : > { %972 = vmatmul.msk.bf16.vlgmr.msrb.gmra.mxu2 %vm481_vm1, %v643_v29 }
 0x479   : > { %v1123_v15 = vpop.eup %1122 }
 0x47a   : > { %v702_v31 = vmul.f32 %v1123_v15, %v1117_v18 }
 0x47c   : > { %v703_v34 = vpack.c.bf16 %v702_v31, %v702_v31 }
 0x48a   : > { %v705_v32 = vpop.permute.xlu1 %704 }
 0x48b   : > { %v710_v33 = vsel %vm525_vm2, %v705_v32, 0 }
 0x48c   : > { %719 = vmatpush.bf16.msra.mxu0 %v710_v33 }
 0x48f   : > { %974 = vmatmul.msk.bf16.vlgmr.msra.gmra.mxu0 %vm481_vm1, %v703_v34 }
 0x4f2   : > { %v601_v35 = vpop.f32.mrf.mxu0 }
 0x4f9   : > { %v661_v36 = vpop.f32.mrf.mxu2 }
 0x4fa   : > { %730 = vrot.lane.b32.xlu0 %v661_v36, %s1412_s12  ;;  %v603_v37 = vpop.f32.mrf.mxu0 }
 0x501   : > { %v663_v38 = vpop.f32.mrf.mxu2 }
 0x502   : > { %726 = vrot.lane.b32.xlu0 %v601_v35, %s1413_s26 }
 0x50c   : > { %v721_v39 = vpop.f32.mrf.mxu0 }
 0x50d   : > { %734 = vrot.lane.b32.xlu0 %v721_v39, %s1414_s14 }
 0x514   : > { %v723_v40 = vpop.f32.mrf.mxu0 }
 0x56c   : > { %v731_v43 = vpop.permute.xlu0 %730 }
 0x574   : > { %v727_v44 = vpop.permute.xlu0 %726 }
 0x575   : > { %v737_v46 = vsel %vm481_vm1, %v1644_v45, %v727_v44 }
 0x576   : > { %v739_v47 = vsel %vm738_vm3, %v737_v46, %v731_v43 }
 0x57f   : > { %v735_v48 = vpop.permute.xlu0 %734 }
 0x580   : > { %v741_v49 = vsel %vm740_vm4, %v739_v47, %v735_v48 }
 0x581   : > { %v742_v50 = vpack.c.bf16 %v741_v49, %v741_v49 }
 0x583   : > { %983 = vmatmul.msk.bf16.vlgmr.msra.gmra.mxu1 %vm438_vm0, %v742_v50 }
 0x600   : > { %v767_v45 = vpop.f32.mrf.mxu1 }
 0x601   : > { %771 = vst [vmem:[%s413_s23] sm:$0xff] %v767_v45 }
 0x602   : > { %1331 = shalt.err (!%p1328_p11)
}
 0x603   : > { %1010 = dma.vmem_to_hbm [thread:$0]  (%p1530_p4), %s787_s4, 128, %s789_s30, %s773_s8  }
 0x608   : > { %v769_v51 = vpop.f32.mrf.mxu1 }
 0x609 PF: > { %s1746_s1 = sld [smem:[#allocation19_spill]] }
 0x60a   : > { %s1748_s29 = sld [smem:[#allocation21_spill]] }
 0x60f   : > { %s800_s9 = sand.u32 1, %s1746_s1  }
 0x610   : > { %p1749_p12 = scmp.ge.s32.totalorder %s1748_s29, 2  ;;  %s801_s15 = scalar_lea.sflag [#allocation4], %s800_s9 }
 0x612   : > { %p1033_p13 = pnand %p1749_p12, %p1538_p9 }
 0x614   : > { %p1034_p0 = pneg %p1033_p13 }
 0x616   : > { %1373 = dma.done.wait (%p1034_p0), %s801_s15, 128  }
 0x617   : > { %1375 = vsyncadd (%p1034_p0), %s801_s15, 4294967168  ;;  %s27_s26 = sadd.s32 1, %s1748_s29   ;;  %s1750_s13 = sld [smem:[#allocation20_spill]] }
 0x618   : > { %p24_p2 = scmp.ge.s32.totalorder %s27_s26, 4   ;;  %s1751_s23 = sld [smem:[#allocation23_spill]] }
 0x619   : > { %s1752_s19 = sld [smem:[#allocation22_spill]]  ;;  %s1753_s21 = smov %s1382_s22 }
 0x61a   : > { %s1755_s24 = smov %s1394_s25 }
 0x61b   :  { %26 = sbr.rel (!%p24_p2) target bundleno = 16 (0x10), region = 129 }
 0x61d   : > { %s1754_s22 = smov %s1750_s13 }
 0x61f   : > { %s1756_s25 = smov %s1752_s19 }
 0x620   :  { %807 = vsyncpa [#allocation3], 1 }
 0x621   :  { %809 = vsyncpa [#allocation3 + $0x1], 1 }
 0x622   :  { %810 = vsyncpa [#allocation6], 1 }
 0x623   :  { %812 = vsyncpa [#allocation6 + $0x1], 1 }
 0x624   :  { %813 = vsyncpa [#allocation9], 1 }
 0x625   :  { %814 = vsyncpa [#allocation12], 1 }
 0x626   :  { %815 = vsyncpa [#allocation4], 1 }
 0x627   :  { %817 = vsyncpa [#allocation4 + $0x1], 1 }

</bundles_post_ra>
